<compile_context>
chip_gen: v7x
topology: tpu7x:2x2x1
jax: 0.10.0
libtpu: 0.0.40
codegen_flags: <defaults>
</compile_context>

<pallas_src>
import jax
import jax.numpy as jnp
from jax.experimental import pallas as pl
from jax.experimental.pallas import tpu as pltpu


# ----------------------------------------------------------------------------- helpers

def _round_up(x, m):
    return (x + m - 1) // m * m


def _pick_tn(hp, max_tn):
    """Largest multiple of 128 that divides hp and is <= max_tn (hp is a 128-multiple)."""
    tn = max(128, (min(hp, max_tn) // 128) * 128)
    while hp % tn:
        tn -= 128
    return tn


_DEFAULTS_CACHE = None


def _tpu_defaults():
    """Per-generation tile / VMEM defaults (queried once, defensively)."""
    global _DEFAULTS_CACHE
    if _DEFAULTS_CACHE is None:
        vmem = 128 << 20
        is_v5 = False
        try:
            info = pltpu.get_tpu_info()
            vmem = int(getattr(info, "vmem_capacity_bytes", vmem))
            is_v5 = "v5" in str(getattr(info, "chip_version", "")).lower()
        except Exception:
            pass
        small_vmem = vmem < (100 << 20)          # v7x-class (64 MiB per TensorCore)
        _DEFAULTS_CACHE = dict(
            vmem_target=(min(int(0.85 * vmem), 56 << 20) if small_vmem
                         else int(0.85 * vmem)),
            max_tn=256 if small_vmem else 512,   # halve streamed slabs on 64-MiB VMEM
            max_tb=128 if is_v5 else 256,        # v5e MXU is 4x128^2; 256 on v6e/v7x
        )
    return _DEFAULTS_CACHE


# ----------------------------------------------------------------------------- kernels

def mlstm_mult_kernel(data_ref, h0_ref, wmx_ref, wmh_ref, m_ref):
    """m = (data @ Wmx^T) * (h0 @ Wmh^T) for one (batch tile, hidden-column tile)."""
    mx = jnp.dot(data_ref[...], wmx_ref[0], preferred_element_type=jnp.float32)
    mh = jnp.dot(h0_ref[...], wmh_ref[0], preferred_element_type=jnp.float32)
    m_ref[...] = (mx * mh).astype(m_ref.dtype)


def mlstm_gates_kernel(xm_ref, c0_ref, w_ref, b_ref, h1_ref, c1_ref):
    """Fused gate matmul + nonlinearities for one (hidden-column tile, batch tile)."""
    j = pl.program_id(0)
    tn = h1_ref.shape[1]

    # One MXU issue: [data | m] @ [Wx^T ; Wh^T] for all 4 gates of this column block.
    # The x-path + m-path add happens in the f32 accumulator; bias added once.
    acts = jnp.dot(xm_ref[...], w_ref[0], preferred_element_type=jnp.float32)
    acts = acts + b_ref[j]                      # resident bias, (1, 4*TN) broadcast

    i_g = jax.nn.sigmoid(acts[:, 0 * tn:1 * tn])
    f_g = jax.nn.sigmoid(acts[:, 1 * tn:2 * tn])
    o_g = jax.nn.sigmoid(acts[:, 2 * tn:3 * tn])
    u_g = jnp.tanh(acts[:, 3 * tn:4 * tn])

    c0 = c0_ref[...].astype(jnp.float32)        # state never silently downcast
    c1 = f_g * c0 + i_g * u_g
    h1 = o_g * jnp.tanh(c1)

    c1_ref[...] = c1.astype(c1_ref.dtype)
    h1_ref[...] = h1.astype(h1_ref.dtype)


# ----------------------------------------------------------------------------- prep

def prepare_mlstm_params(params, *, compute_dtype=None, max_tn=None):
    """One-time weight repack (hoisted out of the per-step path).

    PyTorch layouts: wx (4H, D), wh (4H, H), wh_b (4H,), wmx (H, D), wmh (H, H).
    Produces:
      w_fused   (nj, Dp+Hp, 4*TN) : per-j contiguous fused slab; wx/wh stacked on K,
                                    gates side-by-side on N for hidden block j.
      bias      (nj, 1, 4*TN)     : matching per-j, per-gate bias (f32, VMEM-resident).
      wmx_tiled (nj, Dp, TN), wmh_tiled (nj, Hp, TN): contiguous column slabs for m.
    Weights are stored in `compute_dtype` (e.g. bf16) for cheap HBM streaming + fast MXU.
    """
    wx, wh, b = params["wx"], params["wh"], params["wh_b"]
    wmx, wmh = params["wmx"], params["wmh"]
    H, D = wmx.shape
    Dp, Hp = _round_up(D, 128), _round_up(H, 128)
    if max_tn is None:
        max_tn = _tpu_defaults()["max_tn"]
    TN = _pick_tn(Hp, max_tn)
    nj = Hp // TN
    cdt = jnp.dtype(compute_dtype) if compute_dtype is not None else jnp.dtype(wx.dtype)

    def tile_cols(w_t, rows_p):
        # (in, out) weight -> contiguous per-j column slabs (nj, rows_p, TN).
        w_t = jnp.pad(w_t, ((0, rows_p - w_t.shape[0]), (0, Hp - w_t.shape[1])))
        return w_t.reshape(rows_p, nj, TN).transpose(1, 0, 2)

    def tile_gate_cols(w, rows, rows_p):
        # PyTorch (4H, rows) -> (nj, rows_p, 4*TN) with gate g at columns [g*TN:(g+1)*TN].
        w4 = w.reshape(4, H, rows).transpose(0, 2, 1)                # (4, rows, H)
        w4 = jnp.pad(w4, ((0, 0), (0, rows_p - rows), (0, Hp - H)))  # (4, rows_p, Hp)
        w4 = w4.reshape(4, rows_p, nj, TN).transpose(2, 1, 0, 3)     # (nj, rows_p, 4, TN)
        return w4.reshape(nj, rows_p, 4 * TN)

    wxg = tile_gate_cols(wx, D, Dp)                                  # (nj, Dp, 4*TN)
    whg = tile_gate_cols(wh, H, Hp)                                  # (nj, Hp, 4*TN)
    w_fused = jnp.concatenate([wxg, whg], axis=1).astype(cdt)        # (nj, Dp+Hp, 4*TN)

    b4 = jnp.pad(b.reshape(4, H), ((0, 0), (0, Hp - H)))             # (4, Hp)
    bias = (b4.reshape(4, nj, TN).transpose(1, 0, 2)
              .reshape(nj, 1, 4 * TN).astype(jnp.float32))           # (nj, 1, 4*TN)

    return {
        "w_fused": w_fused,
        "bias": bias,
        "wmx_tiled": tile_cols(wmx.T, Dp).astype(cdt),               # (nj, Dp, TN)
        "wmh_tiled": tile_cols(wmh.T, Hp).astype(cdt),               # (nj, Hp, TN)
    }


# ----------------------------------------------------------------------------- wrapper

def mlstm_cell(data, h0, c0, prepared, *, max_tb=None):
    """One mLSTM step: returns (h1, c1) of shape (B, H)."""
    B, D = data.shape
    H = h0.shape[1]

    w_fused = prepared["w_fused"]                # (nj, K, 4*TN), K = Dp + Hp
    bias = prepared["bias"]                      # (nj, 1, 4*TN)
    wmx_t = prepared["wmx_tiled"]                # (nj, Dp, TN)
    wmh_t = prepared["wmh_tiled"]                # (nj, Hp, TN)
    nj, Dp, TN = wmx_t.shape
    Hp = wmh_t.shape[1]
    K = w_fused.shape[1]

    cdt = w_fused.dtype                          # MXU-operand / streaming dtype
    cbytes = jnp.dtype(cdt).itemsize
    hbytes = jnp.dtype(h0.dtype).itemsize
    sbytes = jnp.dtype(c0.dtype).itemsize

    defaults = _tpu_defaults()
    if max_tb is None:
        max_tb = defaults["max_tb"]
    TB = min(max_tb, _round_up(B, 8))
    Bp = _round_up(B, TB)
    ni = Bp // TB
    vmem_target = defaults["vmem_target"]

    data_c = jnp.pad(data, ((0, Bp - B), (0, Dp - D))).astype(cdt)
    h0_c = jnp.pad(h0, ((0, Bp - B), (0, Hp - H))).astype(cdt)
    c0_p = jnp.pad(c0, ((0, Bp - B), (0, Hp - H)))            # stays in state dtype

    # ---- kernel 1: multiplicative state m (hoisted out of the gate kernel) ---------
    m_need = cbytes * (2 * TB * (Dp + Hp) + 2 * (Dp + Hp) * TN + 2 * TB * TN)
    m_vmem = int(min(m_need * 1.25 + (2 << 20), vmem_target))

    m = pl.pallas_call(
        mlstm_mult_kernel,
        out_shape=jax.ShapeDtypeStruct((Bp, Hp), cdt),
        grid=(nj, ni),                                          # j outer, batch inner
        in_specs=[
            pl.BlockSpec((TB, Dp), lambda j, i: (i, 0)),        # data
            pl.BlockSpec((TB, Hp), lambda j, i: (i, 0)),        # h0
            pl.BlockSpec((1, Dp, TN), lambda j, i: (j, 0, 0)),  # wmx slab (held over i)
            pl.BlockSpec((1, Hp, TN), lambda j, i: (j, 0, 0)),  # wmh slab (held over i)
        ],
        out_specs=pl.BlockSpec((TB, TN), lambda j, i: (i, j)),
        compiler_params=pltpu.CompilerParams(
            dimension_semantics=("parallel", "parallel"),
            vmem_limit_bytes=m_vmem),
        cost_estimate=pl.CostEstimate(
            flops=2 * Bp * Hp * (Dp + Hp),
            transcendentals=0,
            bytes_accessed=cbytes * (nj * Bp * (Dp + Hp) + (Dp + Hp) * Hp + Bp * Hp)),
    )(data_c, h0_c, wmx_t, wmh_t)

    # Lane-aligned fused MXU operand [data | m] (tiny: Bp*(Dp+Hp) bytes, built by XLA).
    xm = jnp.concatenate([data_c, m], axis=1)                   # (Bp, K)

    # ---- kernel 2: fused gate matmul + cell update ----------------------------------
    g_need = (2 * TB * K * cbytes                               # xm blocks
              + 2 * K * 4 * TN * cbytes                         # fused weight slabs
              + nj * 4 * TN * 4                                 # resident bias (f32)
              + 2 * TB * TN * (2 * sbytes + hbytes))            # c0, c1, h1 blocks
    g_vmem = int(min(g_need * 1.25 + (2 << 20), vmem_target))

    cost = pl.CostEstimate(
        flops=2 * Bp * 4 * Hp * K,
        transcendentals=5 * Bp * Hp,
        bytes_accessed=(cbytes * (nj * Bp * K + K * 4 * Hp) + 4 * 4 * Hp
                        + (2 * sbytes + hbytes) * Bp * Hp))

    # NOTE: on 128-MiB v5e/v6e, pipeline_mode=pl.Buffered(3) on the weight spec can
    # hide slab-to-slab DMA jitter when there is a single batch tile; keep depth 2
    # on v7x (64 MiB VMEM).
    h1_p, c1_p = pl.pallas_call(
        mlstm_gates_kernel,
        out_shape=(jax.ShapeDtypeStruct((Bp, Hp), h0.dtype),
                   jax.ShapeDtypeStruct((Bp, Hp), c0.dtype)),
        grid=(nj, ni),                                          # j outer, batch inner
        in_specs=[
            pl.BlockSpec((TB, K), lambda j, i: (i, 0)),         # xm = [data | m]
            pl.BlockSpec((TB, TN), lambda j, i: (i, j)),        # c0
            pl.BlockSpec((1, K, 4 * TN), lambda j, i: (j, 0, 0)),  # fused weights
            pl.BlockSpec((nj, 1, 4 * TN), lambda j, i: (0, 0, 0)),  # bias (resident)
        ],
        out_specs=(
            pl.BlockSpec((TB, TN), lambda j, i: (i, j)),        # h1
            pl.BlockSpec((TB, TN), lambda j, i: (i, j)),        # c1
        ),
        input_output_aliases={1: 1},                            # c0 -> c1
        compiler_params=pltpu.CompilerParams(
            dimension_semantics=("parallel", "parallel"),
            vmem_limit_bytes=g_vmem),
        cost_estimate=cost,
    )(xm, c0_p, w_fused, bias)

    return h1_p[:B, :H], c1_p[:B, :H]


# ----------------------------------------------------------------------------- reference

def init_params(key, data_size, hidden_size, dtype=jnp.float32):
    """Synthetic init matching nn.Linear shapes (U(-k, k), k = 1/sqrt(fan_in))."""
    ks = jax.random.split(key, 5)
    kx = 1.0 / jnp.sqrt(data_size)
    kh = 1.0 / jnp.sqrt(hidden_size)
    return {
        "wx":   jax.random.uniform(ks[0], (4 * hidden_size, data_size), dtype, -kx, kx),
        "wh":   jax.random.uniform(ks[1], (4 * hidden_size, hidden_size), dtype, -kh, kh),
        "wh_b": jax.random.uniform(ks[2], (4 * hidden_size,), dtype, -kh, kh),
        "wmx":  jax.random.uniform(ks[3], (hidden_size, data_size), dtype, -kx, kx),
        "wmh":  jax.random.uniform(ks[4], (hidden_size, hidden_size), dtype, -kh, kh),
    }


def mlstm_cell_ref(data, h0, c0, p):
    """Pure-JAX reference mirroring the PyTorch forward."""
    m = (data @ p["wmx"].T) * (h0 @ p["wmh"].T)
    gates = data @ p["wx"].T + m @ p["wh"].T + p["wh_b"]
    i, f, o, u = jnp.split(gates, 4, axis=1)
    c1 = jax.nn.sigmoid(f) * c0 + jax.nn.sigmoid(i) * jnp.tanh(u)
    h1 = jax.nn.sigmoid(o) * jnp.tanh(c1)
    return h1, c1


# ----------------------------------------------------------------------------- demo

if __name__ == "__main__":
    key = jax.random.PRNGKey(0)
    kd, kh0, kc0, kp = jax.random.split(key, 4)
    step = jax.jit(mlstm_cell, static_argnames=("max_tb",))

    def check(B, D, H, *, compute_dtype=None, max_tn=None, max_tb=None, tol=1e-4):
        data = jax.random.normal(kd, (B, D), jnp.float32)
        h0 = jax.random.normal(kh0, (B, H), jnp.float32)
        c0 = jax.random.normal(kc0, (B, H), jnp.float32)
        params = init_params(kp, D, H)
        prepared = prepare_mlstm_params(params, compute_dtype=compute_dtype,
                                        max_tn=max_tn)
        h1, c1 = step(data, h0, c0, prepared, max_tb=max_tb)
        jax.block_until_ready((h1, c1))
        h1_r, c1_r = mlstm_cell_ref(data, h0, c0, params)
        assert jnp.allclose(h1, h1_r, atol=tol, rtol=tol), f"h1 mismatch B={B} H={H}"
        assert jnp.allclose(c1, c1_r, atol=tol, rtol=tol), f"c1 mismatch B={B} H={H}"

    # f32 path, single-tile grid.
    check(8, 16, 32, tol=1e-4)
    # f32 path, multi-tile grid (nj=2 column blocks, 3 batch tiles): exercises the
    # held-weight sweep, resident-bias slicing and the c0->c1 alias across blocks.
    check(24, 16, 160, max_tn=128, max_tb=8, tol=1e-4)
    # bf16 MXU operands (weights / data / m) with f32 accumulation and f32 state.
    check(8, 16, 32, compute_dtype=jnp.bfloat16, tol=3e-2)

    print("KERNEL_OK")
</pallas_src>

<mosaic_0001>
module attributes {stable_mosaic.version = 11 : i64} {
  func.func @mlstm_mult_kernel(%arg0: i32, %arg1: i32, %arg2: memref<8x128xf32, #tpu.memory_space<vmem>>, %arg3: memref<8x128xf32, #tpu.memory_space<vmem>>, %arg4: memref<1x128x128xf32, #tpu.memory_space<vmem>>, %arg5: memref<1x128x128xf32, #tpu.memory_space<vmem>>, %arg6: memref<8x128xf32, #tpu.memory_space<vmem>>) attributes {dimension_semantics = [#tpu.dimension_semantics<parallel>, #tpu.dimension_semantics<parallel>], iteration_bounds = array<i64: 1, 1>, scalar_prefetch = 0 : i64, scratch_operands = 0 : i64, tpu.core_type = #tpu.core_type<tc>, window_params = [{transform_indices = @transform_0, window_bounds = array<i64: 8, 128>}, {transform_indices = @transform_1, window_bounds = array<i64: 8, 128>}, {transform_indices = @transform_2, window_bounds = array<i64: 1, 128, 128>}, {transform_indices = @transform_3, window_bounds = array<i64: 1, 128, 128>}, {transform_indices = @transform_4, window_bounds = array<i64: 8, 128>}]} {
    %c0 = arith.constant 0 : index
    %c0_0 = arith.constant 0 : index
    %0 = vector.load %arg2[%c0, %c0_0] : memref<8x128xf32, #tpu.memory_space<vmem>>, vector<8x128xf32>
    %c0_1 = arith.constant 0 : index
    %c0_2 = arith.constant 0 : index
    %c0_3 = arith.constant 0 : index
    %1 = vector.load %arg4[%c0_1, %c0_2, %c0_3] : memref<1x128x128xf32, #tpu.memory_space<vmem>>, vector<1x128x128xf32>
    %2 = vector.shape_cast %1 : vector<1x128x128xf32> to vector<128x128xf32>
    %cst = arith.constant dense<0.000000e+00> : vector<8x128xf32>
    %3 = tpu.matmul %0, %2, %cst {dimension_numbers = #tpu.dot_dimension_numbers<[1], [0], [0], [1], [0, 0, 1, 1], [], []>} : vector<8x128xf32>, vector<128x128xf32>, vector<8x128xf32> -> vector<8x128xf32>
    %c0_4 = arith.constant 0 : index
    %c0_5 = arith.constant 0 : index
    %4 = vector.load %arg3[%c0_4, %c0_5] : memref<8x128xf32, #tpu.memory_space<vmem>>, vector<8x128xf32>
    %c0_6 = arith.constant 0 : index
    %c0_7 = arith.constant 0 : index
    %c0_8 = arith.constant 0 : index
    %5 = vector.load %arg5[%c0_6, %c0_7, %c0_8] : memref<1x128x128xf32, #tpu.memory_space<vmem>>, vector<1x128x128xf32>
    %6 = vector.shape_cast %5 : vector<1x128x128xf32> to vector<128x128xf32>
    %cst_9 = arith.constant dense<0.000000e+00> : vector<8x128xf32>
    %7 = tpu.matmul %4, %6, %cst_9 {dimension_numbers = #tpu.dot_dimension_numbers<[1], [0], [0], [1], [0, 0, 1, 1], [], []>} : vector<8x128xf32>, vector<128x128xf32>, vector<8x128xf32> -> vector<8x128xf32>
    %8 = arith.mulf %3, %7 : vector<8x128xf32>
    %c0_10 = arith.constant 0 : index
    %c0_11 = arith.constant 0 : index
    %9 = vector.load %arg6[%c0_10, %c0_11] : memref<8x128xf32, #tpu.memory_space<vmem>>, vector<8x128xf32>
    tpu.vector_store %arg6[%c0_10, %c0_11], %8 {strides = array<i32>} : memref<8x128xf32, #tpu.memory_space<vmem>>, vector<8x128xf32>,
    return
  }
  func.func @transform_0(%arg0: i32, %arg1: i32) -> (i32, i32) {
    %c0_i32 = arith.constant 0 : i32
    %c0_i32_0 = arith.constant 0 : i32
    return %arg1, %c0_i32 : i32, i32
  }
  func.func @transform_1(%arg0: i32, %arg1: i32) -> (i32, i32) {
    %c0_i32 = arith.constant 0 : i32
    %c0_i32_0 = arith.constant 0 : i32
    return %arg1, %c0_i32 : i32, i32
  }
  func.func @transform_2(%arg0: i32, %arg1: i32) -> (i32, i32, i32) {
    %c0_i32 = arith.constant 0 : i32
    %c0_i32_0 = arith.constant 0 : i32
    %c0_i32_1 = arith.constant 0 : i32
    return %arg0, %c0_i32, %c0_i32_0 : i32, i32, i32
  }
  func.func @transform_3(%arg0: i32, %arg1: i32) -> (i32, i32, i32) {
    %c0_i32 = arith.constant 0 : i32
    %c0_i32_0 = arith.constant 0 : i32
    %c0_i32_1 = arith.constant 0 : i32
    return %arg0, %c0_i32, %c0_i32_0 : i32, i32, i32
  }
  func.func @transform_4(%arg0: i32, %arg1: i32) -> (i32, i32) {
    %c0_i32 = arith.constant 0 : i32
    return %arg1, %arg0 : i32, i32
  }
}

module attributes {stable_mosaic.version = 11 : i64} {
  func.func @mlstm_gates_kernel(%arg0: i32, %arg1: i32, %arg2: memref<8x256xf32, #tpu.memory_space<vmem>>, %arg3: memref<8x128xf32, #tpu.memory_space<vmem>>, %arg4: memref<1x256x512xf32, #tpu.memory_space<vmem>>, %arg5: memref<1x1x512xf32, #tpu.memory_space<vmem>>, %arg6: memref<8x128xf32, #tpu.memory_space<vmem>>, %arg7: memref<8x128xf32, #tpu.memory_space<vmem>>) attributes {dimension_semantics = [#tpu.dimension_semantics<parallel>, #tpu.dimension_semantics<parallel>], iteration_bounds = array<i64: 1, 1>, scalar_prefetch = 0 : i64, scratch_operands = 0 : i64, tpu.core_type = #tpu.core_type<tc>, window_params = [{transform_indices = @transform_0, window_bounds = array<i64: 8, 256>}, {transform_indices = @transform_1, window_bounds = array<i64: 8, 128>}, {transform_indices = @transform_2, window_bounds = array<i64: 1, 256, 512>}, {pipeline_mode = #tpu.pipeline_mode<synchronous>, transform_indices = @transform_3, window_bounds = array<i64: 1, 1, 512>}, {transform_indices = @transform_4, window_bounds = array<i64: 8, 128>}, {transform_indices = @transform_5, window_bounds = array<i64: 8, 128>}]} {
    %c0 = arith.constant 0 : index
    %c0_0 = arith.constant 0 : index
    %0 = vector.load %arg2[%c0, %c0_0] : memref<8x256xf32, #tpu.memory_space<vmem>>, vector<8x256xf32>
    %c0_1 = arith.constant 0 : index
    %c0_2 = arith.constant 0 : index
    %c0_3 = arith.constant 0 : index
    %1 = vector.load %arg4[%c0_1, %c0_2, %c0_3] : memref<1x256x512xf32, #tpu.memory_space<vmem>>, vector<1x256x512xf32>
    %2 = vector.shape_cast %1 : vector<1x256x512xf32> to vector<256x512xf32>
    %cst = arith.constant dense<0.000000e+00> : vector<8x512xf32>
    %3 = tpu.matmul %0, %2, %cst {dimension_numbers = #tpu.dot_dimension_numbers<[1], [0], [0], [1], [0, 0, 1, 1], [], []>} : vector<8x256xf32>, vector<256x512xf32>, vector<8x512xf32> -> vector<8x512xf32>
    %4 = arith.index_cast %arg0 : i32 to index
    %c0_4 = arith.constant 0 : index
    %c0_5 = arith.constant 0 : index
    %5 = vector.load %arg5[%4, %c0_4, %c0_5] : memref<1x1x512xf32, #tpu.memory_space<vmem>>, vector<1x1x512xf32>
    %6 = vector.shape_cast %5 : vector<1x1x512xf32> to vector<1x512xf32>
    %7 = vector.broadcast %6 : vector<1x512xf32> to vector<8x512xf32>
    %8 = arith.addf %3, %7 : vector<8x512xf32>
    %9 = vector.extract_strided_slice %8 {offsets = [0, 0], sizes = [8, 128], strides = [1, 1]} : vector<8x512xf32> to vector<8x128xf32>
    %10 = arith.negf %9 : vector<8x128xf32>
    %11 = math.exp %10 : vector<8x128xf32>
    %cst_6 = arith.constant 1.000000e+00 : f32
    %12 = vector.broadcast %cst_6 : f32 to vector<8x128xf32>
    %13 = arith.addf %12, %11 : vector<8x128xf32>
    %14 = arith.divf %12, %13 : vector<8x128xf32>
    %15 = vector.extract_strided_slice %8 {offsets = [0, 128], sizes = [8, 128], strides = [1, 1]} : vector<8x512xf32> to vector<8x128xf32>
    %16 = arith.negf %15 : vector<8x128xf32>
    %17 = math.exp %16 : vector<8x128xf32>
    %cst_7 = arith.constant 1.000000e+00 : f32
    %18 = vector.broadcast %cst_7 : f32 to vector<8x128xf32>
    %19 = arith.addf %18, %17 : vector<8x128xf32>
    %20 = arith.divf %18, %19 : vector<8x128xf32>
    %21 = vector.extract_strided_slice %8 {offsets = [0, 256], sizes = [8, 128], strides = [1, 1]} : vector<8x512xf32> to vector<8x128xf32>
    %22 = arith.negf %21 : vector<8x128xf32>
    %23 = math.exp %22 : vector<8x128xf32>
    %cst_8 = arith.constant 1.000000e+00 : f32
    %24 = vector.broadcast %cst_8 : f32 to vector<8x128xf32>
    %25 = arith.addf %24, %23 : vector<8x128xf32>
    %26 = arith.divf %24, %25 : vector<8x128xf32>
    %27 = vector.extract_strided_slice %8 {offsets = [0, 384], sizes = [8, 128], strides = [1, 1]} : vector<8x512xf32> to vector<8x128xf32>
    %28 = math.tanh %27 : vector<8x128xf32>
    %c0_9 = arith.constant 0 : index
    %c0_10 = arith.constant 0 : index
    %29 = vector.load %arg3[%c0_9, %c0_10] : memref<8x128xf32, #tpu.memory_space<vmem>>, vector<8x128xf32>
    %30 = arith.mulf %20, %29 : vector<8x128xf32>
    %31 = arith.mulf %14, %28 : vector<8x128xf32>
    %32 = arith.addf %30, %31 : vector<8x128xf32>
    %33 = math.tanh %32 : vector<8x128xf32>
    %34 = arith.mulf %26, %33 : vector<8x128xf32>
    %c0_11 = arith.constant 0 : index
    %c0_12 = arith.constant 0 : index
    %35 = vector.load %arg7[%c0_11, %c0_12] : memref<8x128xf32, #tpu.memory_space<vmem>>, vector<8x128xf32>
    tpu.vector_store %arg7[%c0_11, %c0_12], %32 {strides = array<i32>} : memref<8x128xf32, #tpu.memory_space<vmem>>, vector<8x128xf32>,
    %c0_13 = arith.constant 0 : index
    %c0_14 = arith.constant 0 : index
    %36 = vector.load %arg6[%c0_13, %c0_14] : memref<8x128xf32, #tpu.memory_space<vmem>>, vector<8x128xf32>
    tpu.vector_store %arg6[%c0_13, %c0_14], %34 {strides = array<i32>} : memref<8x128xf32, #tpu.memory_space<vmem>>, vector<8x128xf32>,
    return
  }
  func.func @transform_0(%arg0: i32, %arg1: i32) -> (i32, i32) {
    %c0_i32 = arith.constant 0 : i32
    %c0_i32_0 = arith.constant 0 : i32
    return %arg1, %c0_i32 : i32, i32
  }
  func.func @transform_1(%arg0: i32, %arg1: i32) -> (i32, i32) {
    %c0_i32 = arith.constant 0 : i32
    return %arg1, %arg0 : i32, i32
  }
  func.func @transform_2(%arg0: i32, %arg1: i32) -> (i32, i32, i32) {
    %c0_i32 = arith.constant 0 : i32
    %c0_i32_0 = arith.constant 0 : i32
    %c0_i32_1 = arith.constant 0 : i32
    return %arg0, %c0_i32, %c0_i32_0 : i32, i32, i32
  }
  func.func @transform_3(%arg0: i32, %arg1: i32) -> (i32, i32, i32) {
    %c0_i32 = arith.constant 0 : i32
    %c0_i32_0 = arith.constant 0 : i32
    %c0_i32_1 = arith.constant 0 : i32
    %c0_i32_2 = arith.constant 0 : i32
    return %c0_i32, %c0_i32_0, %c0_i32_1 : i32, i32, i32
  }
  func.func @transform_4(%arg0: i32, %arg1: i32) -> (i32, i32) {
    %c0_i32 = arith.constant 0 : i32
    return %arg1, %arg0 : i32, i32
  }
  func.func @transform_5(%arg0: i32, %arg1: i32) -> (i32, i32) {
    %c0_i32 = arith.constant 0 : i32
    return %arg1, %arg0 : i32, i32
  }
}

</mosaic_0001>

<bundles_post_ra>
// kernel: mlstm_cell.2
= control target key start
LH: loop header
LB: loop body
LE: loop exit
PB: predicated region body
PF: predicated region fallthrough
CT: control target
= control target key end

     0   :  { %9 = vsyncpa [#allocation3], 0  ;;  %s515_s0 = inlined_call_operand.vmem [shape: f32[8,128], index: 0, kind: input, shape index: {}]   ;;  %s516_s1 = inlined_call_operand.vmem [shape: f32[8,128], index: 1, kind: input, shape index: {}]   ;;  %s517_s2 = inlined_call_operand.hbm [shape: f32[1,128,128], index: 2, kind: input, shape index: {}]   ;;  %s518_s3 = inlined_call_operand.hbm [shape: f32[1,128,128], index: 3, kind: input, shape index: {}]   ;;  %s519_s4 = inlined_call_operand.vmem [shape: f32[8,128], index: 4, kind: output, shape index: {}]  }
   0x1   :  { %10 = vsyncpa [#allocation5], 0  ;;  %s434_s15 = smov [#allocation2]   ;;  %s386_s19 = scalar_lea.hbm %s517_s2, 2048 }
   0x2   :  { %s20_s16 = sshll.u32 %s434_s15, 4  ;;  %p387_p0 = scmp.ne.s32.totalorder %s517_s2, %s386_s19  ;;  %s21_s16 = int_to_ptr.vmem [resolvable:$true] %s20_s16 }
   0x3   :  { %p390_p1 = scmp.lt.u32.totalorder %s386_s19, %s517_s2 }
   0x5   :  { %p392_p2 = pnand %p390_p1, %p387_p0 }
   0x7   :  { %395 = shalt.err (!%p392_p2)
}
   0x8   :  { %s396_s24 = scalar_lea.vmem %s21_s16, 2048  ;;  %p401_p4 = scmp.lt.s32.totalorder %s21_s16, %s21_s16 }
   0x9   :  { %p397_p3 = scmp.ne.s32.totalorder %s21_s16, %s396_s24  ;;  %p402_p5 = scmp.lt.s32.totalorder %s396_s24, %s396_s24 }
   0xb   :  { %p403_p6 = por %p402_p5, %p401_p4 }
   0xd   :  { %p404_p7 = pnand %p403_p6, %p397_p3 }
   0xf   :  { %407 = shalt.err (!%p404_p7)
}
  0x10   :  { %s435_s25 = smov 128   ;;  %s436_s26 = smov 8  }
  0x11   :  { %26 = dma.hbm_to_vmem [thread:$0]  %s517_s2, 2048, %s21_s16, [#allocation3], %s435_s25, %s435_s25, %s436_s26  }
  0x12   :  { %s437_s29 = smov [#allocation4]   ;;  %s408_s7 = scalar_lea.hbm %s518_s3, 2048 }
  0x13   :  { %s32_s30 = sshll.u32 %s437_s29, 4  ;;  %p409_p8 = scmp.ne.s32.totalorder %s518_s3, %s408_s7  ;;  %s33_s30 = int_to_ptr.vmem [resolvable:$true] %s32_s30 }
  0x14   :  { %p412_p9 = scmp.lt.u32.totalorder %s408_s7, %s518_s3 }
  0x16   :  { %p414_p10 = pnand %p412_p9, %p409_p8 }
  0x18   :  { %417 = shalt.err (!%p414_p10)
}
  0x19   :  { %s418_s12 = scalar_lea.vmem %s33_s30, 2048  ;;  %p423_p12 = scmp.lt.s32.totalorder %s33_s30, %s33_s30 }
  0x1a   :  { %p419_p11 = scmp.ne.s32.totalorder %s33_s30, %s418_s12  ;;  %p424_p13 = scmp.lt.s32.totalorder %s418_s12, %s418_s12 }
  0x1c   :  { %p425_p0 = por %p424_p13, %p423_p12 }
  0x1e   :  { %p426_p1 = pnand %p425_p0, %p419_p11 }
  0x20   :  { %429 = shalt.err (!%p426_p1)
}
  0x21   :  { %38 = dma.hbm_to_vmem [thread:$0]  %s518_s3, 2048, %s33_s30, [#allocation5], %s435_s25, %s435_s25, %s436_s26  }
  0x22   :  { %430 = dma.done.wait [#allocation3], 2048  }
  0x23   :  { %431 = vsyncadd [#allocation3], 4294965248 }
  0x24   :  { %432 = dma.done.wait [#allocation5], 2048  }
  0x25   :  { %433 = vsyncadd [#allocation5], 4294965248  ;;  %v438_v0 = vmov 0.0|0.0   ;;  %vm439_vm0 = vmmov 0   ;;  %v440_v1 = vmov 0.0   ;;  %v46_v2 = vld [vmem:[#allocation2] sm:$0xff] }
  0x26   :  { %331 = vmatprep.subr.bf16.mxu0 %v438_v0  ;;  %355 = vmatprep.subr.bf16.mxu1 %v438_v0  ;;  %v47_v3 = vld [vmem:[#allocation2 + $0x8] sm:$0xff]  ;;  %v133_v4 = vld [vmem:[#allocation4] sm:$0xff]  ;;  %v48_v7 = vld [vmem:[#allocation2 + $0x10] sm:$0xff] }
  0x27   :  { %293 = vmatprep.mubr.msk.f32.mxu0 %vm439_vm0, %v440_v1  ;;  %328 = vmatprep.mubr.msk.f32.mxu1 %vm439_vm0, %v440_v1  ;;  %v332_v5 = vpack.c.bf16 %v47_v3, %v46_v2  ;;  %v134_v6 = vld [vmem:[#allocation4 + $0x8] sm:$0xff]  ;;  %v49_v8 = vld [vmem:[#allocation2 + $0x18] sm:$0xff]  ;;  %v135_v10 = vld [vmem:[#allocation4 + $0x10] sm:$0xff] }
  0x28   :  { %v356_v9 = vpack.c.bf16 %v134_v6, %v133_v4  ;;  %v136_v11 = vld [vmem:[#allocation4 + $0x18] sm:$0xff]  ;;  %v335_v12 = vpack.c.bf16 %v49_v8, %v48_v7  ;;  %v50_v14 = vld [vmem:[#allocation2 + $0x20] sm:$0xff]  ;;  %v51_v15 = vld [vmem:[#allocation2 + $0x28] sm:$0xff] }
  0x29   :  { %333 = vmatpush3.bf16.msra.mxu0 %v332_v5  ;;  %v359_v13 = vpack.c.bf16 %v136_v11, %v135_v10  ;;  %v137_v16 = vld [vmem:[#allocation4 + $0x20] sm:$0xff]  ;;  %v138_v17 = vld [vmem:[#allocation4 + $0x28] sm:$0xff]  ;;  %v338_v18 = vpack.c.bf16 %v51_v15, %v50_v14  ;;  %v52_v20 = vld [vmem:[#allocation2 + $0x30] sm:$0xff] }
  0x2a   :  { %357 = vmatpush3.bf16.msra.mxu1 %v356_v9  ;;  %334 = vmatprep.subr.bf16.mxu0 %v438_v0  ;;  %v362_v19 = vpack.c.bf16 %v138_v17, %v137_v16  ;;  %v53_v21 = vld [vmem:[#allocation2 + $0x38] sm:$0xff]  ;;  %v139_v22 = vld [vmem:[#allocation4 + $0x30] sm:$0xff]  ;;  %v54_v26 = vld [vmem:[#allocation2 + $0x40] sm:$0xff] }
  0x2b   :  { %358 = vmatprep.subr.bf16.mxu1 %v438_v0  ;;  %v140_v23 = vld [vmem:[#allocation4 + $0x38] sm:$0xff]  ;;  %v341_v24 = vpack.c.bf16 %v53_v21, %v52_v20  ;;  %v55_v27 = vld [vmem:[#allocation2 + $0x48] sm:$0xff]  ;;  %v141_v28 = vld [vmem:[#allocation4 + $0x40] sm:$0xff] }
  0x2c   :  { %v365_v25 = vpack.c.bf16 %v140_v23, %v139_v22  ;;  %v142_v29 = vld [vmem:[#allocation4 + $0x48] sm:$0xff]  ;;  %v344_v30 = vpack.c.bf16 %v55_v27, %v54_v26  ;;  %v56_v32 = vld [vmem:[#allocation2 + $0x50] sm:$0xff]  ;;  %v57_v33 = vld [vmem:[#allocation2 + $0x58] sm:$0xff] }
  0x2d   :  { %336 = vmatpush3.bf16.msra.mxu0 %v335_v12  ;;  %v368_v31 = vpack.c.bf16 %v142_v29, %v141_v28  ;;  %v143_v34 = vld [vmem:[#allocation4 + $0x50] sm:$0xff]  ;;  %v144_v35 = vld [vmem:[#allocation4 + $0x58] sm:$0xff]  ;;  %v347_v36 = vpack.c.bf16 %v57_v33, %v56_v32  ;;  %v58_v38 = vld [vmem:[#allocation2 + $0x60] sm:$0xff] }
  0x2e   :  { %360 = vmatpush3.bf16.msra.mxu1 %v359_v13  ;;  %337 = vmatprep.subr.bf16.mxu0 %v438_v0  ;;  %v371_v37 = vpack.c.bf16 %v144_v35, %v143_v34  ;;  %v59_v39 = vld [vmem:[#allocation2 + $0x68] sm:$0xff]  ;;  %v145_v40 = vld [vmem:[#allocation4 + $0x60] sm:$0xff]  ;;  %v60_v44 = vld [vmem:[#allocation2 + $0x70] sm:$0xff] }
  0x2f   :  { %361 = vmatprep.subr.bf16.mxu1 %v438_v0  ;;  %v146_v41 = vld [vmem:[#allocation4 + $0x68] sm:$0xff]  ;;  %v350_v42 = vpack.c.bf16 %v59_v39, %v58_v38  ;;  %v61_v45 = vld [vmem:[#allocation2 + $0x78] sm:$0xff]  ;;  %v147_v46 = vld [vmem:[#allocation4 + $0x70] sm:$0xff] }
  0x30   :  { %v374_v43 = vpack.c.bf16 %v146_v41, %v145_v40  ;;  %v148_v47 = vld [vmem:[#allocation4 + $0x78] sm:$0xff]  ;;  %v353_v48 = vpack.c.bf16 %v61_v45, %v60_v44 }
  0x31   :  { %339 = vmatpush3.bf16.msra.mxu0 %v338_v18  ;;  %v377_v49 = vpack.c.bf16 %v148_v47, %v147_v46  ;;  %v45_v50 = vld [vmem:[%s515_s0] sm:$0xff] }
  0x32   :  { %363 = vmatpush3.bf16.msra.mxu1 %v362_v19  ;;  %340 = vmatprep.subr.bf16.mxu0 %v438_v0  ;;  %v132_v51 = vld [vmem:[%s516_s1] sm:$0xff] }
  0x33   :  { %364 = vmatprep.subr.bf16.mxu1 %v438_v0 }
  0x35   :  { %342 = vmatpush3.bf16.msra.mxu0 %v341_v24 }
  0x36   :  { %366 = vmatpush3.bf16.msra.mxu1 %v365_v25  ;;  %343 = vmatprep.subr.bf16.mxu0 %v438_v0 }
  0x37   :  { %367 = vmatprep.subr.bf16.mxu1 %v438_v0 }
  0x39   :  { %345 = vmatpush3.bf16.msra.mxu0 %v344_v30 }
  0x3a   :  { %369 = vmatpush3.bf16.msra.mxu1 %v368_v31  ;;  %346 = vmatprep.subr.bf16.mxu0 %v438_v0 }
  0x3b   :  { %370 = vmatprep.subr.bf16.mxu1 %v438_v0 }
  0x3d   :  { %348 = vmatpush3.bf16.msra.mxu0 %v347_v36 }
  0x3e   :  { %372 = vmatpush3.bf16.msra.mxu1 %v371_v37  ;;  %349 = vmatprep.subr.bf16.mxu0 %v438_v0 }
  0x3f   :  { %373 = vmatprep.subr.bf16.mxu1 %v438_v0 }
  0x41   :  { %351 = vmatpush3.bf16.msra.mxu0 %v350_v42 }
  0x42   :  { %375 = vmatpush3.bf16.msra.mxu1 %v374_v43  ;;  %352 = vmatprep.subr.bf16.mxu0 %v438_v0 }
  0x43   :  { %376 = vmatprep.subr.bf16.mxu1 %v438_v0 }
  0x45   :  { %354 = vmatpush3.bf16.msra.mxu0 %v353_v48 }
  0x46   :  { %378 = vmatpush3.bf16.msra.mxu1 %v377_v49 }
  0x48   :  { %294 = vmatmul.mubr.f32.vlgmr.msra.gmra.mrb[0].mxu0 %v45_v50 }
  0x49   :  { %329 = vmatmul.mubr.f32.vlgmr.msra.gmra.mrb[0].mxu1 %v132_v51 }
 0x11b   :  { %v128_v52 = vpop.f32.mrb[0].mxu0 }
 0x11c   :  { %v215_v53 = vpop.f32.mrb[0].mxu1  ;;  %v295_v54 = vpop.f32.mrb[1].mxu0 }
 0x11d   :  { %v219_v55 = vmul.f32 %v215_v53, %v128_v52  ;;  %v330_v56 = vpop.f32.mrb[1].mxu1 }
 0x11f   :  { %220 = vst [vmem:[%s519_s4] sm:$0xff] %v219_v55 }
 0x120   :  { %225 = vsyncpa [#allocation3], 1 }
 0x121   :  { %226 = vsyncpa [#allocation5], 1 }

// kernel: mlstm_cell.3
= control target key start
LH: loop header
LB: loop body
LE: loop exit
PB: predicated region body
PF: predicated region fallthrough
CT: control target
= control target key end

     0   :  { %11 = vsyncpa [#allocation3], 0  ;;  %s648_s0 = inlined_call_operand.vmem [shape: f32[8,256], index: 0, kind: input, shape index: {}]   ;;  %s649_s1 = inlined_call_operand.vmem [shape: f32[8,128], index: 1, kind: input, shape index: {}, may-alias: {1,5}]   ;;  %s650_s2 = inlined_call_operand.hbm [shape: f32[1,256,512], index: 2, kind: input, shape index: {}]   ;;  %s651_s3 = inlined_call_operand.vmem [shape: f32[1,1,512], index: 3, kind: input, shape index: {}]   ;;  %s652_s4 = inlined_call_operand.hbm [shape: f32[8,128], index: 4, kind: output, shape index: {0}]   ;;  %s653_s5 = inlined_call_operand.vmem [shape: f32[8,128], index: 5, kind: output, shape index: {1}, may-alias: {1,5}]  }
   0x1   :  { %12 = vsyncpa [#allocation4], 0  ;;  %s575_s18 = smov [#allocation2]   ;;  %s527_s22 = scalar_lea.hbm %s650_s2, 16384 }
   0x2   :  { %s22_s19 = sshll.u32 %s575_s18, 4  ;;  %p528_p0 = scmp.ne.s32.totalorder %s650_s2, %s527_s22  ;;  %s23_s19 = int_to_ptr.vmem [resolvable:$true] %s22_s19 }
   0x3   :  { %p531_p1 = scmp.lt.u32.totalorder %s527_s22, %s650_s2 }
   0x5   :  { %p533_p2 = pnand %p531_p1, %p528_p0 }
   0x7   :  { %536 = shalt.err (!%p533_p2)
}
   0x8   :  { %s537_s27 = scalar_lea.vmem %s23_s19, 16384  ;;  %p542_p4 = scmp.lt.s32.totalorder %s23_s19, %s23_s19 }
   0x9   :  { %p538_p3 = scmp.ne.s32.totalorder %s23_s19, %s537_s27  ;;  %p543_p5 = scmp.lt.s32.totalorder %s537_s27, %s537_s27 }
   0xb   :  { %p544_p6 = por %p543_p5, %p542_p4 }
   0xd   :  { %p545_p7 = pnand %p544_p6, %p538_p3 }
   0xf   :  { %548 = shalt.err (!%p545_p7)
}
  0x10   :  { %s576_s28 = smov 512   ;;  %s577_s29 = smov 32  }
  0x11   :  { %28 = dma.hbm_to_vmem [thread:$0]  %s650_s2, 16384, %s23_s19, [#allocation3], %s576_s28, %s576_s28, %s577_s29  }
  0x12   :  { %571 = dma.done.wait [#allocation3], 16384  }
  0x13   :  { %572 = vsyncadd [#allocation3], 4294950912  ;;  %v37_v0 = vld [vmem:[#allocation2 + $0x8] sm:$0xff]  ;;  %v36_v2 = vld [vmem:[#allocation2] sm:$0xff]  ;;  %s578_s14 = smov [#allocation5]  }
  0x14   :  { %v41_v1 = vld [vmem:[#allocation2 + $0x28] sm:$0xff]  ;;  %v40_v4 = vld [vmem:[#allocation2 + $0x20] sm:$0xff]  ;;  %v39_v18 = vld [vmem:[#allocation2 + $0x18] sm:$0xff]  ;;  %s363_s15 = sshll.u32 %s578_s14, 4  ;;  %s364_s15 = int_to_ptr.vmem [resolvable:$true] %s363_s15 }
  0x15   :  { %v379_v3 = vpack.c.bf16 %v41_v1, %v37_v0  ;;  %v45_v5 = vld [vmem:[#allocation2 + $0x48] sm:$0xff]  ;;  %v381_v7 = vpack.c.bf16 %v40_v4, %v36_v2  ;;  %v44_v9 = vld [vmem:[#allocation2 + $0x40] sm:$0xff]  ;;  %v43_v19 = vld [vmem:[#allocation2 + $0x38] sm:$0xff]  ;;  %p554_p9 = scmp.lt.s32.totalorder %s364_s15, %s364_s15 }
  0x16   :  { %v49_v6 = vld [vmem:[#allocation2 + $0x68] sm:$0xff]  ;;  %v48_v10 = vld [vmem:[#allocation2 + $0x60] sm:$0xff]  ;;  %v443_v21 = vpack.c.bf16 %v43_v19, %v39_v18  ;;  %v38_v22 = vld [vmem:[#allocation2 + $0x10] sm:$0xff] }
  0x17   :  { %v383_v8 = vpack.c.bf16 %v49_v6, %v45_v5  ;;  %v53_v11 = vld [vmem:[#allocation2 + $0x88] sm:$0xff]  ;;  %380 = vmatprep.subr.bf16.mxu0 %v379_v3  ;;  %v385_v13 = vpack.c.bf16 %v48_v10, %v44_v9  ;;  %v52_v14 = vld [vmem:[#allocation2 + $0x80] sm:$0xff]  ;;  %v42_v23 = vld [vmem:[#allocation2 + $0x30] sm:$0xff] }
  0x18   :  { %v57_v12 = vld [vmem:[#allocation2 + $0xa8] sm:$0xff]  ;;  %382 = vmatpush1.bf16.msra.mxu0 %v381_v7  ;;  %v56_v15 = vld [vmem:[#allocation2 + $0xa0] sm:$0xff]  ;;  %v445_v24 = vpack.c.bf16 %v42_v23, %v38_v22  ;;  %444 = vmatprep.subr.bf16.mxu1 %v443_v21  ;;  %v47_v26 = vld [vmem:[#allocation2 + $0x58] sm:$0xff] }
  0x19   :  { %384 = vmatprep.subr.bf16.mxu0 %v383_v8  ;;  %v387_v16 = vpack.c.bf16 %v57_v12, %v53_v11  ;;  %v61_v17 = vld [vmem:[#allocation2 + $0xc8] sm:$0xff]  ;;  %v389_v25 = vpack.c.bf16 %v56_v15, %v52_v14  ;;  %v51_v27 = vld [vmem:[#allocation2 + $0x78] sm:$0xff]  ;;  %v46_v28 = vld [vmem:[#allocation2 + $0x50] sm:$0xff] }
  0x1a   :  { %v65_v20 = vld [vmem:[#allocation2 + $0xe8] sm:$0xff]  ;;  %v60_v30 = vld [vmem:[#allocation2 + $0xc0] sm:$0xff]  ;;  %446 = vmatpush1.bf16.msra.mxu1 %v445_v24  ;;  %v447_v32 = vpack.c.bf16 %v51_v27, %v47_v26  ;;  %v50_v33 = vld [vmem:[#allocation2 + $0x70] sm:$0xff] }
  0x1b   :  { %v391_v29 = vpack.c.bf16 %v65_v20, %v61_v17  ;;  %v64_v31 = vld [vmem:[#allocation2 + $0xe0] sm:$0xff]  ;;  %v69_v34 = vld [vmem:[#allocation2 + $0x108] sm:$0xff]  ;;  %v449_v36 = vpack.c.bf16 %v50_v33, %v46_v28  ;;  %v55_v37 = vld [vmem:[#allocation2 + $0x98] sm:$0xff] }
  0x1c   :  { %386 = vmatpush1.bf16.msra.mxu0 %v385_v13  ;;  %v73_v35 = vld [vmem:[#allocation2 + $0x128] sm:$0xff]  ;;  %448 = vmatprep.subr.bf16.mxu1 %v447_v32  ;;  %v59_v38 = vld [vmem:[#allocation2 + $0xb8] sm:$0xff]  ;;  %v54_v39 = vld [vmem:[#allocation2 + $0x90] sm:$0xff]  ;;  %v393_v41 = vpack.c.bf16 %v64_v31, %v60_v30 }
  0x1d   :  { %388 = vmatprep.subr.bf16.mxu0 %v387_v16  ;;  %v58_v40 = vld [vmem:[#allocation2 + $0xb0] sm:$0xff]  ;;  %v68_v42 = vld [vmem:[#allocation2 + $0x100] sm:$0xff]  ;;  %v451_v44 = vpack.c.bf16 %v59_v38, %v55_v37  ;;  %v395_v45 = vpack.c.bf16 %v73_v35, %v69_v34  ;;  %v77_v46 = vld [vmem:[#allocation2 + $0x148] sm:$0xff] }
  0x1e   :  { %v72_v43 = vld [vmem:[#allocation2 + $0x120] sm:$0xff]  ;;  %450 = vmatpush1.bf16.msra.mxu1 %v449_v36  ;;  %v453_v47 = vpack.c.bf16 %v58_v40, %v54_v39  ;;  %v63_v48 = vld [vmem:[#allocation2 + $0xd8] sm:$0xff]  ;;  %v81_v50 = vld [vmem:[#allocation2 + $0x168] sm:$0xff] }
  0x1f   :  { %v67_v49 = vld [vmem:[#allocation2 + $0xf8] sm:$0xff]  ;;  %452 = vmatprep.subr.bf16.mxu1 %v451_v44  ;;  %v62_v52 = vld [vmem:[#allocation2 + $0xd0] sm:$0xff]  ;;  %v397_v54 = vpack.c.bf16 %v72_v43, %v68_v42  ;;  %v399_v57 = vpack.c.bf16 %v81_v50, %v77_v46  ;;  %v76_v58 = vld [vmem:[#allocation2 + $0x140] sm:$0xff] }
  0x20   :  { %390 = vmatpush1.bf16.msra.mxu0 %v389_v25  ;;  %v455_v51 = vpack.c.bf16 %v67_v49, %v63_v48  ;;  %v66_v53 = vld [vmem:[#allocation2 + $0xf0] sm:$0xff]  ;;  %v71_v55 = vld [vmem:[#allocation2 + $0x118] sm:$0xff]  ;;  %v80_v59 = vld [vmem:[#allocation2 + $0x160] sm:$0xff] }
  0x21   :  { %392 = vmatprep.subr.bf16.mxu0 %v391_v29  ;;  %v75_v56 = vld [vmem:[#allocation2 + $0x138] sm:$0xff]  ;;  %v85_v60 = vld [vmem:[#allocation2 + $0x188] sm:$0xff]  ;;  %v457_v61 = vpack.c.bf16 %v66_v53, %v62_v52  ;;  %v70_v0 = vld [vmem:[#allocation2 + $0x110] sm:$0xff]  ;;  %v401_v4 = vpack.c.bf16 %v80_v59, %v76_v58 }
  0x22   :  { %454 = vmatpush1.bf16.msra.mxu1 %v453_v47  ;;  %v89_v62 = vld [vmem:[#allocation2 + $0x1a8] sm:$0xff]  ;;  %v459_v63 = vpack.c.bf16 %v75_v56, %v71_v55  ;;  %v74_v1 = vld [vmem:[#allocation2 + $0x130] sm:$0xff]  ;;  %v79_v2 = vld [vmem:[#allocation2 + $0x158] sm:$0xff] }
  0x23   :  { %456 = vmatprep.subr.bf16.mxu1 %v455_v51  ;;  %v83_v3 = vld [vmem:[#allocation2 + $0x178] sm:$0xff]  ;;  %v403_v5 = vpack.c.bf16 %v89_v62, %v85_v60  ;;  %v84_v6 = vld [vmem:[#allocation2 + $0x180] sm:$0xff]  ;;  %v93_v8 = vld [vmem:[#allocation2 + $0x1c8] sm:$0xff]  ;;  %v461_v9 = vpack.c.bf16 %v74_v1, %v70_v0 }
  0x24   :  { %394 = vmatpush1.bf16.msra.mxu0 %v393_v41  ;;  %v88_v7 = vld [vmem:[#allocation2 + $0x1a0] sm:$0xff]  ;;  %v97_v10 = vld [vmem:[#allocation2 + $0x1e8] sm:$0xff]  ;;  %v463_v11 = vpack.c.bf16 %v83_v3, %v79_v2  ;;  %v78_v12 = vld [vmem:[#allocation2 + $0x150] sm:$0xff] }
  0x25   :  { %396 = vmatprep.subr.bf16.mxu0 %v395_v45  ;;  %v82_v13 = vld [vmem:[#allocation2 + $0x170] sm:$0xff]  ;;  %v87_v14 = vld [vmem:[#allocation2 + $0x198] sm:$0xff]  ;;  %v405_v16 = vpack.c.bf16 %v88_v7, %v84_v6  ;;  %v407_v17 = vpack.c.bf16 %v97_v10, %v93_v8  ;;  %v92_v18 = vld [vmem:[#allocation2 + $0x1c0] sm:$0xff] }
  0x26   :  { %458 = vmatpush1.bf16.msra.mxu1 %v457_v61  ;;  %v91_v15 = vld [vmem:[#allocation2 + $0x1b8] sm:$0xff]  ;;  %v96_v19 = vld [vmem:[#allocation2 + $0x1e0] sm:$0xff]  ;;  %v101_v20 = vld [vmem:[#allocation2 + $0x208] sm:$0xff]  ;;  %v465_v21 = vpack.c.bf16 %v82_v13, %v78_v12 }
  0x27   :  { %460 = vmatprep.subr.bf16.mxu1 %v459_v63  ;;  %v105_v22 = vld [vmem:[#allocation2 + $0x228] sm:$0xff]  ;;  %v467_v23 = vpack.c.bf16 %v91_v15, %v87_v14  ;;  %v86_v24 = vld [vmem:[#allocation2 + $0x190] sm:$0xff]  ;;  %v95_v26 = vld [vmem:[#allocation2 + $0x1d8] sm:$0xff]  ;;  %v409_v28 = vpack.c.bf16 %v96_v19, %v92_v18 }
  0x28   :  { %398 = vmatpush1.bf16.msra.mxu0 %v397_v54  ;;  %v90_v25 = vld [vmem:[#allocation2 + $0x1b0] sm:$0xff]  ;;  %v99_v27 = vld [vmem:[#allocation2 + $0x1f8] sm:$0xff]  ;;  %v411_v29 = vpack.c.bf16 %v105_v22, %v101_v20  ;;  %v100_v30 = vld [vmem:[#allocation2 + $0x200] sm:$0xff] }
  0x29   :  { %400 = vmatprep.subr.bf16.mxu0 %v399_v57  ;;  %v104_v31 = vld [vmem:[#allocation2 + $0x220] sm:$0xff]  ;;  %v109_v32 = vld [vmem:[#allocation2 + $0x248] sm:$0xff]  ;;  %v469_v33 = vpack.c.bf16 %v90_v25, %v86_v24  ;;  %v471_v35 = vpack.c.bf16 %v99_v27, %v95_v26  ;;  %v94_v36 = vld [vmem:[#allocation2 + $0x1d0] sm:$0xff] }
  0x2a   :  { %462 = vmatpush1.bf16.msra.mxu1 %v461_v9  ;;  %v113_v34 = vld [vmem:[#allocation2 + $0x268] sm:$0xff]  ;;  %v98_v37 = vld [vmem:[#allocation2 + $0x1f0] sm:$0xff]  ;;  %v103_v38 = vld [vmem:[#allocation2 + $0x218] sm:$0xff]  ;;  %v413_v40 = vpack.c.bf16 %v104_v31, %v100_v30 }
  0x2b   :  { %464 = vmatprep.subr.bf16.mxu1 %v463_v11  ;;  %v107_v39 = vld [vmem:[#allocation2 + $0x238] sm:$0xff]  ;;  %v415_v41 = vpack.c.bf16 %v113_v34, %v109_v32  ;;  %v108_v42 = vld [vmem:[#allocation2 + $0x240] sm:$0xff]  ;;  %v117_v44 = vld [vmem:[#allocation2 + $0x288] sm:$0xff]  ;;  %v473_v45 = vpack.c.bf16 %v98_v37, %v94_v36 }
  0x2c   :  { %402 = vmatpush1.bf16.msra.mxu0 %v401_v4  ;;  %v112_v43 = vld [vmem:[#allocation2 + $0x260] sm:$0xff]  ;;  %v121_v46 = vld [vmem:[#allocation2 + $0x2a8] sm:$0xff]  ;;  %v475_v47 = vpack.c.bf16 %v107_v39, %v103_v38  ;;  %v102_v48 = vld [vmem:[#allocation2 + $0x210] sm:$0xff] }
  0x2d   :  { %404 = vmatprep.subr.bf16.mxu0 %v403_v5  ;;  %v106_v49 = vld [vmem:[#allocation2 + $0x230] sm:$0xff]  ;;  %v111_v50 = vld [vmem:[#allocation2 + $0x258] sm:$0xff]  ;;  %v417_v52 = vpack.c.bf16 %v112_v43, %v108_v42  ;;  %v116_v53 = vld [vmem:[#allocation2 + $0x280] sm:$0xff]  ;;  %v419_v54 = vpack.c.bf16 %v121_v46, %v117_v44 }
  0x2e   :  { %466 = vmatpush1.bf16.msra.mxu1 %v465_v21  ;;  %v115_v51 = vld [vmem:[#allocation2 + $0x278] sm:$0xff]  ;;  %v120_v55 = vld [vmem:[#allocation2 + $0x2a0] sm:$0xff]  ;;  %v125_v56 = vld [vmem:[#allocation2 + $0x2c8] sm:$0xff]  ;;  %v477_v58 = vpack.c.bf16 %v106_v49, %v102_v48 }
  0x2f   :  { %468 = vmatprep.subr.bf16.mxu1 %v467_v23  ;;  %v129_v57 = vld [vmem:[#allocation2 + $0x2e8] sm:$0xff]  ;;  %v479_v59 = vpack.c.bf16 %v115_v51, %v111_v50  ;;  %v110_v60 = vld [vmem:[#allocation2 + $0x250] sm:$0xff]  ;;  %v35_v62 = vld [vmem:[%s648_s0 + $0x8] sm:$0xff]  ;;  %v421_v1 = vpack.c.bf16 %v120_v55, %v116_v53 }
  0x30   :  { %406 = vmatpush1.bf16.msra.mxu0 %v405_v16  ;;  %v114_v61 = vld [vmem:[#allocation2 + $0x270] sm:$0xff]  ;;  %v119_v63 = vld [vmem:[#allocation2 + $0x298] sm:$0xff]  ;;  %252 = vmatprep.mubr.f32.mxu0 %v35_v62  ;;  %v423_v2 = vpack.c.bf16 %v129_v57, %v125_v56  ;;  %v124_v3 = vld [vmem:[#allocation2 + $0x2c0] sm:$0xff] }
  0x31   :  { %408 = vmatprep.subr.bf16.mxu0 %v407_v17  ;;  %v123_v0 = vld [vmem:[#allocation2 + $0x2b8] sm:$0xff]  ;;  %323 = vmatprep.mubr.f32.mxu1 %v35_v62  ;;  %v128_v4 = vld [vmem:[#allocation2 + $0x2e0] sm:$0xff]  ;;  %v133_v5 = vld [vmem:[#allocation2 + $0x308] sm:$0xff]  ;;  %v481_v6 = vpack.c.bf16 %v114_v61, %v110_v60 }
  0x32   :  { %470 = vmatpush1.bf16.msra.mxu1 %v469_v33  ;;  %v137_v7 = vld [vmem:[#allocation2 + $0x328] sm:$0xff]  ;;  %v483_v8 = vpack.c.bf16 %v123_v0, %v119_v63  ;;  %v118_v9 = vld [vmem:[#allocation2 + $0x290] sm:$0xff]  ;;  %v127_v11 = vld [vmem:[#allocation2 + $0x2d8] sm:$0xff]  ;;  %v425_v13 = vpack.c.bf16 %v128_v4, %v124_v3 }
  0x33   :  { %472 = vmatprep.subr.bf16.mxu1 %v471_v35  ;;  %v122_v10 = vld [vmem:[#allocation2 + $0x2b0] sm:$0xff]  ;;  %v131_v12 = vld [vmem:[#allocation2 + $0x2f8] sm:$0xff]  ;;  %v427_v14 = vpack.c.bf16 %v137_v7, %v133_v5  ;;  %v132_v15 = vld [vmem:[#allocation2 + $0x300] sm:$0xff] }
  0x34   :  { %410 = vmatpush1.bf16.msra.mxu0 %v409_v28  ;;  %v136_v16 = vld [vmem:[#allocation2 + $0x320] sm:$0xff]  ;;  %v141_v17 = vld [vmem:[#allocation2 + $0x348] sm:$0xff]  ;;  %v485_v18 = vpack.c.bf16 %v122_v10, %v118_v9  ;;  %v487_v20 = vpack.c.bf16 %v131_v12, %v127_v11  ;;  %v126_v21 = vld [vmem:[#allocation2 + $0x2d0] sm:$0xff] }
  0x35   :  { %412 = vmatprep.subr.bf16.mxu0 %v411_v29  ;;  %v145_v19 = vld [vmem:[#allocation2 + $0x368] sm:$0xff]  ;;  %v130_v22 = vld [vmem:[#allocation2 + $0x2f0] sm:$0xff]  ;;  %v135_v23 = vld [vmem:[#allocation2 + $0x318] sm:$0xff]  ;;  %v429_v25 = vpack.c.bf16 %v136_v16, %v132_v15 }
  0x36   :  { %474 = vmatpush1.bf16.msra.mxu1 %v473_v45  ;;  %v139_v24 = vld [vmem:[#allocation2 + $0x338] sm:$0xff]  ;;  %v431_v26 = vpack.c.bf16 %v145_v19, %v141_v17  ;;  %v140_v27 = vld [vmem:[#allocation2 + $0x340] sm:$0xff]  ;;  %v149_v29 = vld [vmem:[#allocation2 + $0x388] sm:$0xff]  ;;  %v489_v30 = vpack.c.bf16 %v130_v22, %v126_v21 }
  0x37   :  { %476 = vmatprep.subr.bf16.mxu1 %v475_v47  ;;  %v144_v28 = vld [vmem:[#allocation2 + $0x360] sm:$0xff]  ;;  %v153_v31 = vld [vmem:[#allocation2 + $0x3a8] sm:$0xff]  ;;  %v491_v32 = vpack.c.bf16 %v139_v24, %v135_v23  ;;  %v134_v33 = vld [vmem:[#allocation2 + $0x310] sm:$0xff] }
  0x38   :  { %414 = vmatpush1.bf16.msra.mxu0 %v413_v40  ;;  %v138_v34 = vld [vmem:[#allocation2 + $0x330] sm:$0xff]  ;;  %v143_v35 = vld [vmem:[#allocation2 + $0x358] sm:$0xff]  ;;  %v433_v37 = vpack.c.bf16 %v144_v28, %v140_v27  ;;  %v435_v38 = vpack.c.bf16 %v153_v31, %v149_v29  ;;  %v148_v39 = vld [vmem:[#allocation2 + $0x380] sm:$0xff] }
  0x39   :  { %416 = vmatprep.subr.bf16.mxu0 %v415_v41  ;;  %v147_v36 = vld [vmem:[#allocation2 + $0x378] sm:$0xff]  ;;  %v152_v40 = vld [vmem:[#allocation2 + $0x3a0] sm:$0xff]  ;;  %v157_v41 = vld [vmem:[#allocation2 + $0x3c8] sm:$0xff]  ;;  %v493_v42 = vpack.c.bf16 %v138_v34, %v134_v33 }
  0x3a   :  { %478 = vmatpush1.bf16.msra.mxu1 %v477_v58  ;;  %v161_v43 = vld [vmem:[#allocation2 + $0x3e8] sm:$0xff]  ;;  %v495_v44 = vpack.c.bf16 %v147_v36, %v143_v35  ;;  %v142_v45 = vld [vmem:[#allocation2 + $0x350] sm:$0xff]  ;;  %v151_v47 = vld [vmem:[#allocation2 + $0x398] sm:$0xff]  ;;  %v437_v49 = vpack.c.bf16 %v152_v40, %v148_v39 }
  0x3b   :  { %480 = vmatprep.subr.bf16.mxu1 %v479_v59  ;;  %v146_v46 = vld [vmem:[#allocation2 + $0x370] sm:$0xff]  ;;  %v155_v48 = vld [vmem:[#allocation2 + $0x3b8] sm:$0xff]  ;;  %v439_v50 = vpack.c.bf16 %v161_v43, %v157_v41  ;;  %v156_v51 = vld [vmem:[#allocation2 + $0x3c0] sm:$0xff] }
  0x3c   :  { %418 = vmatpush1.bf16.msra.mxu0 %v417_v52  ;;  %v160_v52 = vld [vmem:[#allocation2 + $0x3e0] sm:$0xff]  ;;  %v497_v53 = vpack.c.bf16 %v146_v46, %v142_v45  ;;  %v150_v55 = vld [vmem:[#allocation2 + $0x390] sm:$0xff]  ;;  %v159_v57 = vld [vmem:[#allocation2 + $0x3d8] sm:$0xff] }
  0x3d   :  { %420 = vmatprep.subr.bf16.mxu0 %v419_v54  ;;  %v499_v54 = vpack.c.bf16 %v155_v48, %v151_v47  ;;  %v154_v56 = vld [vmem:[#allocation2 + $0x3b0] sm:$0xff]  ;;  %v163_v58 = vld [vmem:[#allocation2 + $0x3f8] sm:$0xff]  ;;  %v441_v59 = vpack.c.bf16 %v160_v52, %v156_v51 }
  0x3e   :  { %482 = vmatpush1.bf16.msra.mxu1 %v481_v6  ;;  %v501_v60 = vpack.c.bf16 %v154_v56, %v150_v55  ;;  %v503_v61 = vpack.c.bf16 %v163_v58, %v159_v57  ;;  %v158_v62 = vld [vmem:[#allocation2 + $0x3d0] sm:$0xff]  ;;  %v34_v0 = vld [vmem:[%s648_s0] sm:$0xff] }
  0x3f   :  { %484 = vmatprep.subr.bf16.mxu1 %v483_v8  ;;  %v162_v63 = vld [vmem:[#allocation2 + $0x3f0] sm:$0xff]  ;;  %v166_v5 = vld [vmem:[%s651_s3] sm:$0xf] }
  0x40   :  { %422 = vmatpush1.bf16.msra.mxu0 %v421_v1  ;;  %v505_v1 = vpack.c.bf16 %v162_v63, %v158_v62 }
  0x41   :  { %424 = vmatprep.subr.bf16.mxu0 %v423_v2  ;;  %v168_v2 = vlaneseq }
  0x42   :  { %486 = vmatpush1.bf16.msra.mxu1 %v485_v18 }
  0x43   :  { %488 = vmatprep.subr.bf16.mxu1 %v487_v20  ;;  %v169_v3 = vshrl.u32 %v168_v2, 7 }
  0x44   :  { %426 = vmatpush1.bf16.msra.mxu0 %v425_v13 }
  0x45   :  { %428 = vmatprep.subr.bf16.mxu0 %v427_v14  ;;  %v170_v4 = vsub.s32 0, %v169_v3  ;;  %v174_v6 = vsub.s32 1, %v169_v3  ;;  %v178_v9 = vsub.s32 2, %v169_v3  ;;  %v182_v17 = vsub.s32 3, %v169_v3 }
  0x46   :  { %490 = vmatpush1.bf16.msra.mxu1 %v489_v30  ;;  %v349_v30 = vld [vmem:[%s649_s1] sm:$0xff]  ;;  %s549_s1 = scalar_lea.vmem %s364_s15, 128 }
  0x47   :  { %492 = vmatprep.subr.bf16.mxu1 %v491_v32  ;;  %v171_v7 = vrot.slane %v166_v5, %v170_v4  ;;  %v175_v8 = vrot.slane %v166_v5, %v174_v6  ;;  %v179_v15 = vrot.slane %v166_v5, %v178_v9  ;;  %v183_v21 = vrot.slane %v166_v5, %v182_v17  ;;  %p550_p8 = scmp.ne.s32.totalorder %s364_s15, %s549_s1  ;;  %p555_p10 = scmp.lt.s32.totalorder %s549_s1, %s549_s1 }
  0x48   :  { %430 = vmatpush1.bf16.msra.mxu0 %v429_v25 }
  0x49   :  { %432 = vmatprep.subr.bf16.mxu0 %v431_v26  ;;  %p556_p11 = por %p555_p10, %p554_p9 }
  0x4a   :  { %494 = vmatpush1.bf16.msra.mxu1 %v493_v42 }
  0x4b   :  { %496 = vmatprep.subr.bf16.mxu1 %v495_v44  ;;  %p557_p12 = pnand %p556_p11, %p550_p8 }
  0x4c   :  { %434 = vmatpush1.bf16.msra.mxu0 %v433_v37 }
  0x4d   :  { %436 = vmatprep.subr.bf16.mxu0 %v435_v38 }
  0x4e   :  { %498 = vmatpush1.bf16.msra.mxu1 %v497_v53 }
  0x4f   :  { %500 = vmatprep.subr.bf16.mxu1 %v499_v54 }
  0x50   :  { %438 = vmatpush1.bf16.msra.mxu0 %v437_v49 }
  0x51   :  { %440 = vmatprep.subr.bf16.mxu0 %v439_v50 }
  0x52   :  { %502 = vmatpush1.bf16.msra.mxu1 %v501_v60 }
  0x53   :  { %504 = vmatprep.subr.bf16.mxu1 %v503_v61 }
  0x54   :  { %442 = vmatpush1.bf16.msra.mxu0 %v441_v59 }
  0x56   :  { %506 = vmatpush1.bf16.msra.mxu1 %v505_v1 }
  0x57   :  { %253 = vmatmul.mubr.f32.vlgmr.msra.gmra.mrb[0].mxu0 %v34_v0 }
  0x59   :  { %324 = vmatmul.mubr.f32.vlgmr.msra.gmra.mrb[0].mxu1 %v34_v0 }
 0x12a   :  { %v254_v10 = vpop.f32.mrb[0].mxu0 }
 0x12b   :  { %v255_v11 = vadd.f32 %v254_v10, %v171_v7  ;;  %v256_v12 = vpop.f32.mrb[1].mxu0 }
 0x12c   :  { %v257_v13 = vadd.f32 %v256_v12, %v175_v8  ;;  %v325_v18 = vpop.f32.mrb[0].mxu1 }
 0x12d   :  { %v376_v14 = vmul.f32 -1.442695, %v255_v11  ;;  %v327_v19 = vpop.f32.mrb[1].mxu1  ;;  %v326_v20 = vadd.f32 %v325_v18, %v179_v15 }
 0x12e   :  { %v377_v16 = vmul.f32 -1.442695, %v257_v13  ;;  %v328_v23 = vadd.f32 %v327_v19, %v183_v21 }
 0x12f   :  { %511 = vpow2.f32 %v376_v14  ;;  %v378_v22 = vmul.f32 -1.442695, %v326_v20 }
 0x130   :  { %513 = vpow2.f32 %v377_v16 }
 0x131   :  { %515 = vpow2.f32 %v378_v22 }
 0x132   :  { %517 = vtanh.f32 %v328_v23 }
 0x139   :  { %v512_v24 = vpop.eup %511 }
 0x13a   :  { %v514_v25 = vpop.eup %513  ;;  %v333_v26 = vadd.f32 1.0, %v512_v24 }
 0x13b   :  { %v339_v27 = vadd.f32 1.0, %v514_v25  ;;  %v516_v28 = vpop.eup %515 }
 0x13c   :  { %519 = vrcp.f32 %v333_v26  ;;  %v518_v29 = vpop.eup %517  ;;  %v345_v32 = vadd.f32 1.0, %v516_v28 }
 0x13d   :  { %521 = vrcp.f32 %v339_v27 }
 0x13e   :  { %523 = vrcp.f32 %v345_v32 }
 0x146   :  { %v520_v31 = vpop.eup %519 }
 0x147   :  { %v522_v33 = vpop.eup %521  ;;  %v351_v34 = vmul.f32 %v520_v31, %v518_v29 }
 0x148   :  { %v350_v35 = vmul.f32 %v522_v33, %v349_v30  ;;  %v524_v37 = vpop.eup %523 }
 0x14a   :  { %v352_v36 = vadd.f32 %v351_v34, %v350_v35 }
 0x14c   :  { %355 = vst [vmem:[%s653_s5] sm:$0xff] %v352_v36  ;;  %525 = vtanh.f32 %v352_v36 }
 0x156   :  { %v526_v38 = vpop.eup %525 }
 0x157   :  { %v354_v39 = vmul.f32 %v526_v38, %v524_v37 }
 0x159   :  { %356 = vst [vmem:[#allocation5] sm:$0xff] %v354_v39 }
 0x15a   :  { %560 = shalt.err (!%p557_p12)
}
 0x15b   :  { %s561_s18 = scalar_lea.hbm %s652_s4, 128 }
 0x15c   :  { %p562_p13 = scmp.ne.s32.totalorder %s652_s4, %s561_s18  ;;  %p565_p0 = scmp.lt.u32.totalorder %s561_s18, %s652_s4 }
 0x15e   :  { %p567_p1 = pnand %p565_p0, %p562_p13 }
 0x160   :  { %570 = shalt.err (!%p567_p1)
}
 0x161   :  { %366 = dma.vmem_to_hbm [thread:$0]  %s364_s15, 128, %s652_s4, [#allocation4]  }
 0x162   :  { %573 = dma.done.wait [#allocation4], 128  }
 0x163   :  { %574 = vsyncadd [#allocation4], 4294967168 }
 0x164   :  { %374 = vsyncpa [#allocation3], 1 }
 0x165   :  { %375 = vsyncpa [#allocation4], 1 }

</bundles_post_ra>
